<compile_context>
chip_gen: v5e
topology: v5e:2x2
jax: 0.10.0
libtpu: 0.0.40
codegen_flags: <defaults>
</compile_context>

<pallas_src>
import functools
import math

import jax
import jax.numpy as jnp
import numpy as np
from jax import lax
from jax.experimental import pallas as pl
from jax.experimental.pallas import tpu as pltpu

_TARGET_BLOCK_BYTES = 1 * 1024 * 1024  # per-buffer VMEM budget (double-buffered)


def _i32(v: int) -> int:
    """Python int -> equivalent int32 (two's-complement) literal."""
    v &= 0xFFFFFFFF
    return v - (1 << 32) if v >= (1 << 31) else v


_MIX_A = _i32(0x9E3779B9)
_MIX_B = _i32(0x7F4A7C15)
_MIX_C = _i32(0x85EBCA6B)
_MIX_D = _i32(0xC2B2AE35)


def _make_pe_table(seq_len: int, model_dim: int) -> jnp.ndarray:
    """Sinusoidal PE, identical math to the PyTorch __init__ (float32)."""
    assert model_dim % 2 == 0, "model_dim must be even (same limit as torch code)"
    position = jnp.arange(seq_len, dtype=jnp.float32)[:, None]           # (S, 1)
    div_term = jnp.exp(
        jnp.arange(0, model_dim, 2, dtype=jnp.float32)
        * (-math.log(10000.0) / model_dim))                              # (D/2,)
    angles = position * div_term                                         # (S, D/2)
    pe = jnp.zeros((seq_len, model_dim), dtype=jnp.float32)
    pe = pe.at[:, 0::2].set(jnp.sin(angles))
    pe = pe.at[:, 1::2].set(jnp.cos(angles))
    return pe


def _pe_kernel(seed_ref, x_ref, pe_ref, o_ref, *,
               dropout_p: float, training: bool, row_strides):
    # x_ref / pe_ref / o_ref are all (R, W) tiles of the same shape.
    y = x_ref[...] + pe_ref[...]

    if training and dropout_p > 0.0:
        if dropout_p >= 1.0:
            y = jnp.zeros_like(y)
        else:
            R, W = y.shape
            # Global row index of the first row of this tile (per grid axis).
            row0 = pl.program_id(0) * row_strides[0]
            for ax in range(1, len(row_strides)):
                row0 = row0 + pl.program_id(ax) * row_strides[ax]
            base = row0 * W                                    # int32, wrap OK
            r = lax.broadcasted_iota(jnp.int32, (R, W), 0)
            c = lax.broadcasted_iota(jnp.int32, (R, W), 1)
            idx = base + r * W + c                             # global element id
            # murmur3-style finalizer over (element id, seed): int32 VPU ops
            # with logical shifts -> bit-identical to the uint32 formulation.
            h = idx ^ (seed_ref[0] * jnp.int32(_MIX_A) + jnp.int32(_MIX_B))
            h = h ^ lax.shift_right_logical(h, 16)
            h = h * jnp.int32(_MIX_C)
            h = h ^ lax.shift_right_logical(h, 13)
            h = h * jnp.int32(_MIX_D)
            h = h ^ lax.shift_right_logical(h, 16)
            bits24 = lax.shift_right_logical(h, 8)             # uniform in [0, 2^24)
            thr = jnp.int32(int(round(dropout_p * (1 << 24))))
            keep = bits24 >= thr                               # P(drop) == dropout_p
            scale = jnp.asarray(1.0 / (1.0 - dropout_p), dtype=y.dtype)
            y = jnp.where(keep, y * scale, jnp.zeros_like(y))

    o_ref[...] = y.astype(o_ref.dtype)


def positional_encoding(x, pe, *, dropout_p: float = 0.0,
                        training: bool = False, seed: int = 0):
    """x: (B, S, D); pe: (S_max, D) with S <= S_max.  Returns (B, S, D)."""
    B, S, D = x.shape
    assert pe.shape[1] == D and pe.shape[0] >= S
    itemsize = jnp.dtype(x.dtype).itemsize

    # PE for the first S positions, in the compute dtype (bf16 stays bf16).
    pe_sd = pe[:S, :].astype(x.dtype)
    seed_arr = jnp.asarray([seed], dtype=jnp.int32)

    if (S * D) % 128 == 0:
        # ---- lane-dense layouts: kernel last dim is exactly 128 ----
        W = 128
        P = (S * D) // W                        # PE period, in 128-wide rows
        target_rows = max(8, _TARGET_BLOCK_BYTES // (W * itemsize))
        pe_rows = pe_sd.reshape(P, W)

        if P <= target_rows:
            # Flat path: fold batch into rows.  Tiles start on period
            # boundaries, so one replicated PE tile is resident for all steps.
            unit = P * (8 // math.gcd(P, 8))    # lcm(P, 8) keeps tiles 8-aligned
            TR = min(B * P, max(1, target_rows // unit) * unit)
            reps = TR // P
            x_in = x.reshape(B * P, W)
            pe_in = jnp.tile(pe_rows, (reps, 1))               # (TR, W)
            grid = (pl.cdiv(B * P, TR),)
            in_specs = [
                pl.BlockSpec((TR, W), lambda i, s: (i, 0)),
                pl.BlockSpec((TR, W), lambda i, s: (0, 0)),    # resident
            ]
            out_specs = pl.BlockSpec((TR, W), lambda i, s: (i, 0))
            out_struct = jax.ShapeDtypeStruct((B * P, W), x.dtype)
            row_strides = (TR,)
        else:
            # Large S*D: tile the PE period, one batch element per outer step.
            TR = max(8, (min(P, target_rows) // 8) * 8)
            x_in = x.reshape(B, P, W)
            pe_in = pe_rows
            grid = (B, pl.cdiv(P, TR))
            in_specs = [
                pl.BlockSpec((None, TR, W), lambda b, j, s: (b, j, 0)),
                pl.BlockSpec((TR, W), lambda b, j, s: (j, 0)),
            ]
            out_specs = pl.BlockSpec((None, TR, W), lambda b, j, s: (b, j, 0))
            out_struct = jax.ShapeDtypeStruct((B, P, W), x.dtype)
            row_strides = (P, TR)
    else:
        # ---- fallback: keep (B, S, D); last dim D may be lane-masked ----
        W = D
        target_rows = max(8, _TARGET_BLOCK_BYTES // (W * itemsize))
        TS = S if S <= target_rows else max(8, (target_rows // 8) * 8)
        x_in = x
        pe_in = pe_sd
        grid = (B, pl.cdiv(S, TS))
        in_specs = [
            pl.BlockSpec((None, TS, D), lambda b, j, s: (b, j, 0)),
            pl.BlockSpec((TS, D), lambda b, j, s: (j, 0)),
        ]
        out_specs = pl.BlockSpec((None, TS, D), lambda b, j, s: (b, j, 0))
        out_struct = jax.ShapeDtypeStruct((B, S, D), x.dtype)
        row_strides = (S, TS)

    kernel = functools.partial(
        _pe_kernel, dropout_p=float(dropout_p), training=bool(training),
        row_strides=row_strides)

    grid_spec = pltpu.PrefetchScalarGridSpec(
        num_scalar_prefetch=1,
        grid=grid,
        in_specs=in_specs,
        out_specs=out_specs,
    )

    out = pl.pallas_call(
        kernel,
        out_shape=out_struct,
        grid_spec=grid_spec,
        compiler_params=pltpu.CompilerParams(
            dimension_semantics=("parallel",) * len(grid),
        ),
    )(seed_arr, x_in, pe_in)

    return out.reshape(B, S, D)


if __name__ == "__main__":
    # Small shapes consistent with the module: batch=2, seq=8, model_dim=32.
    batch, seq_len, model_dim = 2, 8, 32
    dropout_p = 0.1

    key = jax.random.PRNGKey(0)
    x = jax.random.normal(key, (batch, seq_len, model_dim), dtype=jnp.float32)
    pe = _make_pe_table(seq_len, model_dim)
    ref = x + pe[None, :seq_len, :]

    # Eval mode: dropout is identity -> must match the reference.
    out_eval = jax.block_until_ready(
        positional_encoding(x, pe, dropout_p=dropout_p, training=False))
    np.testing.assert_allclose(np.asarray(out_eval), np.asarray(ref),
                               rtol=1e-6, atol=1e-6)

    # Training mode: in-kernel hash dropout.  Every nonzero output must equal
    # the reference scaled by 1/(1-p); the drop fraction should be near p.
    out_train = jax.block_until_ready(
        positional_encoding(x, pe, dropout_p=dropout_p, training=True, seed=123))
    assert out_train.shape == x.shape
    out_np = np.asarray(out_train)
    ref_np = np.asarray(ref)
    kept = out_np != 0.0
    np.testing.assert_allclose(out_np[kept],
                               (ref_np / (1.0 - dropout_p))[kept],
                               rtol=1e-5, atol=1e-6)
    drop_frac = 1.0 - kept.mean()
    assert 0.0 <= drop_frac <= 0.5, drop_frac

    print("KERNEL_OK")
</pallas_src>

<mosaic_0001>
module attributes {stable_mosaic.version = 11 : i64} {
  func.func @_pe_kernel(%arg0: i32, %arg1: memref<1xi32, #tpu.memory_space<smem>>, %arg2: memref<4x128xf32, #tpu.memory_space<vmem>>, %arg3: memref<4x128xf32, #tpu.memory_space<vmem>>, %arg4: memref<4x128xf32, #tpu.memory_space<vmem>>) attributes {dimension_semantics = [#tpu.dimension_semantics<parallel>], iteration_bounds = array<i64: 1>, scalar_prefetch = 1 : i64, scratch_operands = 0 : i64, tpu.core_type = #tpu.core_type<tc>, window_params = [{transform_indices = @transform_0, window_bounds = array<i64: 4, 128>}, {pipeline_mode = #tpu.pipeline_mode<synchronous>, transform_indices = @transform_1, window_bounds = array<i64: 4, 128>}, {transform_indices = @transform_2, window_bounds = array<i64: 4, 128>}]} {
    %c0 = arith.constant 0 : index
    %c0_0 = arith.constant 0 : index
    %0 = vector.load %arg2[%c0, %c0_0] : memref<4x128xf32, #tpu.memory_space<vmem>>, vector<4x128xf32>
    %c0_1 = arith.constant 0 : index
    %c0_2 = arith.constant 0 : index
    %1 = vector.load %arg3[%c0_1, %c0_2] : memref<4x128xf32, #tpu.memory_space<vmem>>, vector<4x128xf32>
    %2 = arith.addf %0, %1 : vector<4x128xf32>
    %c0_3 = arith.constant 0 : index
    %c0_4 = arith.constant 0 : index
    %3 = vector.load %arg4[%c0_3, %c0_4] : memref<4x128xf32, #tpu.memory_space<vmem>>, vector<4x128xf32>
    tpu.vector_store %arg4[%c0_3, %c0_4], %2 {strides = array<i32>} : memref<4x128xf32, #tpu.memory_space<vmem>>, vector<4x128xf32>,
    return
  }
  func.func @transform_0(%arg0: i32, %arg1: memref<1xi32, #tpu.memory_space<smem>>) -> (i32, i32) {
    %c0_i32 = arith.constant 0 : i32
    %c0_i32_0 = arith.constant 0 : i32
    return %arg0, %c0_i32 : i32, i32
  }
  func.func @transform_1(%arg0: i32, %arg1: memref<1xi32, #tpu.memory_space<smem>>) -> (i32, i32) {
    %c0_i32 = arith.constant 0 : i32
    %c0_i32_0 = arith.constant 0 : i32
    %c0_i32_1 = arith.constant 0 : i32
    return %c0_i32, %c0_i32_0 : i32, i32
  }
  func.func @transform_2(%arg0: i32, %arg1: memref<1xi32, #tpu.memory_space<smem>>) -> (i32, i32) {
    %c0_i32 = arith.constant 0 : i32
    %c0_i32_0 = arith.constant 0 : i32
    return %arg0, %c0_i32 : i32, i32
  }
}

</mosaic_0001>

<bundles_post_ra>
// kernel: tpu_custom_call.1
= control target key start
LH: loop header
LB: loop body
LE: loop exit
PB: predicated region body
PF: predicated region fallthrough
CT: control target
= control target key end

     0   :  { %9 = vsyncpa [#allocation5], 0  ;;  %s177_s0 = inlined_call_operand.<no memory space> [shape: s32[1], index: 0, kind: input, shape index: {}]   ;;  %s178_s1 = inlined_call_operand.hbm [shape: f32[4,128], index: 1, kind: input, shape index: {}]   ;;  %s179_s2 = inlined_call_operand.hbm [shape: f32[4,128], index: 2, kind: input, shape index: {}]   ;;  %s180_s3 = inlined_call_operand.hbm [shape: f32[4,128], index: 3, kind: output, shape index: {}]  }
   0x1   :  { %10 = vsyncpa [#allocation8], 0 }
   0x2   :  { %11 = vsyncpa [#allocation6], 0  ;;  %s17_s14 = sshll.u32 %s178_s1, 4  ;;  %s145_s15 = smov [#allocation4]   ;;  %s18_s14 = int_to_ptr.hbm [resolvable:$true] %s17_s14 }
   0x3   :  { %s19_s16 = sshll.u32 %s145_s15, 4  ;;  %s28_s18 = sshll.u32 %s179_s2, 4  ;;  %s20_s16 = int_to_ptr.vmem [resolvable:$true] %s19_s16  ;;  %s29_s18 = int_to_ptr.hbm [resolvable:$true] %s28_s18 }
   0x4   :  { %22 = dma.hbm_to_vmem [thread:$0]  %s18_s14, 64, %s20_s16, [#allocation5]  }
   0x5   :  { %s146_s19 = smov [#allocation7]  }
   0x6   :  { %s30_s20 = sshll.u32 %s146_s19, 4  ;;  %s31_s20 = int_to_ptr.vmem [resolvable:$true] %s30_s20 }
   0x7   :  { %33 = dma.hbm_to_vmem [thread:$0]  %s29_s18, 64, %s31_s20, [#allocation8]  }
   0x8   :  { %139 = dma.done.wait [#allocation5], 64  }
   0x9   :  { %140 = vsyncadd [#allocation5], 4294967232 }
   0xa   :  { %141 = dma.done.wait [#allocation8], 64  }
   0xb   :  { %142 = vsyncadd [#allocation8], 4294967232  ;;  %s147_s21 = smov [#allocation9]   ;;  %s53_s24 = sshll.u32 %s180_s3, 4  ;;  %v42_v0 = vld [vmem:[#allocation4] sm:$0xf]  ;;  %s54_s24 = int_to_ptr.hbm [resolvable:$true] %s53_s24 }
   0xc   :  { %s51_s1 = sshll.u32 %s147_s21, 4  ;;  %v43_v1 = vld [vmem:[#allocation7] sm:$0xf]  ;;  %s52_s1 = int_to_ptr.vmem [resolvable:$true] %s51_s1 }
   0xd   :  { %v44_v2 = vadd.f32 %v43_v1, %v42_v0 }
   0xf   :  { %45 = vst [vmem:[#allocation9] sm:$0xf] %v44_v2 }
  0x10   :  { %56 = dma.vmem_to_hbm [thread:$0]  %s52_s1, 64, %s54_s24, [#allocation6]  }
  0x11   :  { %143 = dma.done.wait [#allocation6], 64  }
  0x12   :  { %144 = vsyncadd [#allocation6], 4294967232 }
  0x13   :  { %61 = vsyncpa [#allocation5], 1 }
  0x14   :  { %62 = vsyncpa [#allocation8], 1 }
  0x15   :  { %63 = vsyncpa [#allocation6], 1 }

</bundles_post_ra>
